<compile_context>
chip_gen: v6e
topology: v6e:2x2x1
jax: 0.10.0
libtpu: 0.0.40
codegen_flags: <defaults>
</compile_context>

<pallas_src>
import functools

import jax
import jax.numpy as jnp
from jax import lax
from jax.experimental import pallas as pl
from jax.experimental.pallas import tpu as pltpu

LANE = 128
SUBLANE = 8
_UNROLL_SEQ_LEN = 32  # static-unroll threshold for the token-count loop


def _round_up(x: int, m: int) -> int:
    return (x + m - 1) // m * m


def _tpu_generation_defaults():
    """Returns (max_batch_tile, vmem_limit_bytes) tuned per TPU generation."""
    max_tile = 256                   # full MXU M-dim on v6e / v7x
    vmem_limit = 32 * 1024 * 1024    # conservative fallback, safe everywhere
    try:
        info = pltpu.get_tpu_info()
        cap = getattr(info, "vmem_capacity_bytes", None)
        if cap:
            # ~75% of physical VMEM: v5e/v6e (128 MiB) -> 96 MiB, v7x (64) -> 48.
            vmem_limit = min(int(cap) * 3 // 4, 100 * 1024 * 1024)
        if "5" in str(getattr(info, "chip_version", "")):
            max_tile = 128           # v5 MXU is 128-wide
    except Exception:
        pass
    return max_tile, vmem_limit


def dan_kernel(ids_ref, wf_ref, b1_ref, w2_ref, b2_ref, out_ref, *, hidden_size):
    """Fused DAN forward for one batch tile.

    ids_ref: (b_tile, L)      int32 token ids
    wf_ref:  (V_pad, H_pad)   fused (table @ W1) / L, zero padded
    b1_ref:  (1, H_pad)       f32 fc1 bias
    w2_ref:  (H_pad, H_pad)   fc2 weight (pre-transposed, zero padded)
    b2_ref:  (1, H_pad)       f32 fc2 bias
    out_ref: (b_tile, H_pad)  f32 log-probabilities (lane-dense store)
    """
    bt, seq_len = ids_ref.shape
    v_pad = wf_ref.shape[0]
    h_pad = out_ref.shape[1]

    vocab_lane = lax.broadcasted_iota(jnp.int32, (1, v_pad), 1)

    # counts[b, v] = #{l : ids[b, l] == v}; accumulate in int32, cast once.
    if seq_len <= _UNROLL_SEQ_LEN:
        ids = ids_ref[...]                                       # (bt, L)
        counts_i = jnp.zeros((bt, v_pad), jnp.int32)
        for l in range(seq_len):                                 # static unroll
            counts_i = counts_i + (ids[:, l:l + 1] == vocab_lane)
    else:
        def body(l, c):
            tok = ids_ref[:, pl.ds(l, 1)]                        # (bt, 1)
            return c + (tok == vocab_lane)
        counts_i = lax.fori_loop(0, seq_len, body,
                                 jnp.zeros((bt, v_pad), jnp.int32), unroll=4)

    counts = counts_i.astype(wf_ref.dtype)       # small ints -> exact even in bf16

    # mean-pool + fc1 (weight already holds (table @ W1) / L) + ReLU, on the MXU.
    h1 = jnp.dot(counts, wf_ref[...],
                 preferred_element_type=jnp.float32) + b1_ref[...]
    h1 = jnp.maximum(h1, 0.0)                                    # (bt, H_pad)

    # fc2
    h2 = jnp.dot(h1.astype(w2_ref.dtype), w2_ref[...],
                 preferred_element_type=jnp.float32) + b2_ref[...]

    # log_softmax over dim=1, restricted to the valid (un-padded) hidden lanes.
    lane = lax.broadcasted_iota(jnp.int32, (1, h_pad), 1)
    valid = lane < hidden_size
    neg_big = jnp.float32(-1e30)
    m = jnp.max(jnp.where(valid, h2, neg_big), axis=1, keepdims=True)
    s = h2 - m
    p = jnp.where(valid, jnp.exp(s), 0.0)
    lse = jnp.log(jnp.sum(p, axis=1, keepdims=True))
    out_ref[...] = s - lse        # padded lanes hold garbage; sliced off outside


def prepare_dan_params(emb_table, w1, b1, w2, b2, seq_len,
                       param_dtype=jnp.float32):
    """One-time preprocessing (hoisted out of the per-batch forward):
    fuses mean-pool + fc1, folds the 1/L scale, pads to lane-dense shapes and
    casts matmul operands to `param_dtype` (use jnp.bfloat16 at GloVe scale to
    halve VMEM / DMA traffic)."""
    V, E = emb_table.shape
    H = w1.shape[1]
    assert w1.shape[0] == E and w2.shape == (H, H)
    assert b1.shape == (H,) and b2.shape == (H,)

    # fused_w[v, h] = sum_e table[v, e] * W1[e, h] / L  (exact fold: mean-pool
    # and fc1 are linear and the ReLU comes after).
    fused = jnp.dot(emb_table.astype(jnp.float32), w1.astype(jnp.float32),
                    precision=lax.Precision.HIGHEST) * jnp.float32(1.0 / seq_len)

    v_pad = _round_up(V, LANE)
    h_pad = _round_up(H, LANE)
    fused_p = jnp.pad(fused, ((0, v_pad - V), (0, h_pad - H))).astype(param_dtype)
    w2_p = jnp.pad(w2.astype(jnp.float32),
                   ((0, h_pad - H), (0, h_pad - H))).astype(param_dtype)
    b1_p = jnp.pad(b1.astype(jnp.float32), (0, h_pad - H)).reshape(1, h_pad)
    b2_p = jnp.pad(b2.astype(jnp.float32), (0, h_pad - H)).reshape(1, h_pad)

    return dict(fused_w=fused_p, b1=b1_p, w2=w2_p, b2=b2_p,
                hidden_size=H, seq_len=seq_len)


def dan_forward(token_ids, params):
    """token_ids: (B, L) int ids. Returns (B, H) log-probabilities."""
    B, L = token_ids.shape
    assert L == params["seq_len"]
    H = params["hidden_size"]
    fused_p, b1_p = params["fused_w"], params["b1"]
    w2_p, b2_p = params["w2"], params["b2"]
    v_pad, h_pad = fused_p.shape

    max_tile, vmem_limit = _tpu_generation_defaults()
    b_ceil = _round_up(B, SUBLANE)
    b_tile = min(max_tile, b_ceil)
    # Keep >= 2 grid steps when the batch is large enough, so the "parallel"
    # axis can feed both TensorCores on v7x.
    if b_tile == b_ceil and b_ceil >= 2 * LANE:
        b_tile = _round_up(b_ceil // 2, SUBLANE)
    b_pad = _round_up(b_ceil, b_tile)

    # Only the id pad is genuinely per-batch; all weight padding was hoisted.
    ids_p = jnp.pad(token_ids.astype(jnp.int32), ((0, b_pad - B), (0, 0)))

    kernel = functools.partial(dan_kernel, hidden_size=H)

    def run(single_buffer_weights):
        def const_spec(shape):
            # Constant block index -> stays VMEM resident across grid steps.
            kw = ({"pipeline_mode": pl.Buffered(1)}
                  if single_buffer_weights else {})
            return pl.BlockSpec(shape, lambda i: (0, 0), **kw)

        grid_spec = pltpu.PrefetchScalarGridSpec(
            num_scalar_prefetch=0,
            grid=(b_pad // b_tile,),
            in_specs=[
                pl.BlockSpec((b_tile, L), lambda i: (i, 0)),   # batch-tiled ids
                const_spec((v_pad, h_pad)),                    # fused (table@W1)/L
                const_spec((1, h_pad)),                        # b1
                const_spec((h_pad, h_pad)),                    # W2
                const_spec((1, h_pad)),                        # b2
            ],
            out_specs=pl.BlockSpec((b_tile, h_pad), lambda i: (i, 0)),
        )
        out = pl.pallas_call(
            kernel,
            out_shape=jax.ShapeDtypeStruct((b_pad, h_pad), jnp.float32),
            grid_spec=grid_spec,
            compiler_params=pltpu.CompilerParams(
                dimension_semantics=("parallel",),
                vmem_limit_bytes=vmem_limit,
            ),
        )(ids_p, fused_p, b1_p, w2_p, b2_p)
        return jax.block_until_ready(out)

    try:
        # Single-buffer the never-changing weight operands (halves their VMEM).
        out_padded = run(True)
    except Exception:
        # Fallback if this JAX build rejects Buffered(1) on a top-level spec.
        out_padded = run(False)

    return out_padded[:B, :H]


def reference_forward(token_ids, emb_table, w1, b1, w2, b2):
    # Pure-JAX f32 reference of the PyTorch forward (for sanity checking).
    emb = jnp.take(emb_table, token_ids, axis=0)
    op = emb.mean(axis=1)
    h1 = jax.nn.relu(jnp.dot(op, w1, precision=lax.Precision.HIGHEST) + b1)
    h2 = jnp.dot(h1, w2, precision=lax.Precision.HIGHEST) + b2
    return jax.nn.log_softmax(h2, axis=1)


if __name__ == "__main__":
    # Shapes consistent with the randomInit=True branch of DAN:
    # vocab=100, embedding_dim=50, hidden_size=32, batch=2, seq_len=8.
    VOCAB, EMB_DIM, HIDDEN = 100, 50, 32
    B, L = 2, 8

    key = jax.random.PRNGKey(0)
    k_ids, k_emb, k_w1, k_b1, k_w2, k_b2 = jax.random.split(key, 6)

    token_ids = jax.random.randint(k_ids, (B, L), 0, VOCAB, dtype=jnp.int32)
    emb_table = jax.random.normal(k_emb, (VOCAB, EMB_DIM), dtype=jnp.float32)
    # nn.Linear weights stored pre-transposed as (in, out); deterministic init.
    w1 = jax.random.normal(k_w1, (EMB_DIM, HIDDEN), dtype=jnp.float32) * 0.1
    b1 = jax.random.normal(k_b1, (HIDDEN,), dtype=jnp.float32) * 0.1
    w2 = jax.random.normal(k_w2, (HIDDEN, HIDDEN), dtype=jnp.float32) * 0.1
    b2 = jax.random.normal(k_b2, (HIDDEN,), dtype=jnp.float32) * 0.1

    # One-time parameter preprocessing (hoisted out of the per-call path).
    params = prepare_dan_params(emb_table, w1, b1, w2, b2, seq_len=L)

    out = dan_forward(token_ids, params)
    out = jax.block_until_ready(out)

    ref = reference_forward(token_ids, emb_table, w1, b1, w2, b2)
    assert out.shape == (B, HIDDEN)
    # Tolerance covers the MXU's f32 matmul emulation; semantics are identical.
    assert jnp.allclose(out, ref, atol=2e-3, rtol=2e-3), "mismatch vs JAX reference"

    print("KERNEL_OK")
</pallas_src>

<mosaic_0001>
module attributes {stable_mosaic.version = 11 : i64} {
  func.func @dan_kernel(%arg0: i32, %arg1: memref<8x8xi32, #tpu.memory_space<vmem>>, %arg2: memref<128x128xf32, #tpu.memory_space<vmem>>, %arg3: memref<1x128xf32, #tpu.memory_space<vmem>>, %arg4: memref<128x128xf32, #tpu.memory_space<vmem>>, %arg5: memref<1x128xf32, #tpu.memory_space<vmem>>, %arg6: memref<8x128xf32, #tpu.memory_space<vmem>>) attributes {dimension_semantics = [#tpu.dimension_semantics<parallel>], iteration_bounds = array<i64: 1>, scalar_prefetch = 0 : i64, scratch_operands = 0 : i64, tpu.core_type = #tpu.core_type<tc>, window_params = [{transform_indices = @transform_0, window_bounds = array<i64: 8, 8>}, {pipeline_mode = #tpu.pipeline_mode<synchronous>, transform_indices = @transform_1, window_bounds = array<i64: 128, 128>}, {pipeline_mode = #tpu.pipeline_mode<synchronous>, transform_indices = @transform_2, window_bounds = array<i64: 1, 128>}, {pipeline_mode = #tpu.pipeline_mode<synchronous>, transform_indices = @transform_3, window_bounds = array<i64: 128, 128>}, {pipeline_mode = #tpu.pipeline_mode<synchronous>, transform_indices = @transform_4, window_bounds = array<i64: 1, 128>}, {transform_indices = @transform_5, window_bounds = array<i64: 8, 128>}]} {
    %0 = tpu.iota {dimensions = array<i32: 1>} : vector<1x128xi32>
    %c0 = arith.constant 0 : index
    %c0_0 = arith.constant 0 : index
    %1 = vector.load %arg1[%c0, %c0_0] : memref<8x8xi32, #tpu.memory_space<vmem>>, vector<8x8xi32>
    %c0_i32 = arith.constant 0 : i32
    %2 = vector.broadcast %c0_i32 : i32 to vector<8x128xi32>
    %3 = vector.extract_strided_slice %1 {offsets = [0, 0], sizes = [8, 1], strides = [1, 1]} : vector<8x8xi32> to vector<8x1xi32>
    %4 = vector.broadcast %3 : vector<8x1xi32> to vector<8x128xi32>
    %5 = vector.broadcast %0 : vector<1x128xi32> to vector<8x128xi32>
    %6 = arith.cmpi eq, %4, %5 : vector<8x128xi32>
    %7 = arith.extui %6 : vector<8x128xi1> to vector<8x128xi32>
    %8 = arith.addi %2, %7 : vector<8x128xi32>
    %9 = vector.extract_strided_slice %1 {offsets = [0, 1], sizes = [8, 1], strides = [1, 1]} : vector<8x8xi32> to vector<8x1xi32>
    %10 = vector.broadcast %9 : vector<8x1xi32> to vector<8x128xi32>
    %11 = vector.broadcast %0 : vector<1x128xi32> to vector<8x128xi32>
    %12 = arith.cmpi eq, %10, %11 : vector<8x128xi32>
    %13 = arith.extui %12 : vector<8x128xi1> to vector<8x128xi32>
    %14 = arith.addi %8, %13 : vector<8x128xi32>
    %15 = vector.extract_strided_slice %1 {offsets = [0, 2], sizes = [8, 1], strides = [1, 1]} : vector<8x8xi32> to vector<8x1xi32>
    %16 = vector.broadcast %15 : vector<8x1xi32> to vector<8x128xi32>
    %17 = vector.broadcast %0 : vector<1x128xi32> to vector<8x128xi32>
    %18 = arith.cmpi eq, %16, %17 : vector<8x128xi32>
    %19 = arith.extui %18 : vector<8x128xi1> to vector<8x128xi32>
    %20 = arith.addi %14, %19 : vector<8x128xi32>
    %21 = vector.extract_strided_slice %1 {offsets = [0, 3], sizes = [8, 1], strides = [1, 1]} : vector<8x8xi32> to vector<8x1xi32>
    %22 = vector.broadcast %21 : vector<8x1xi32> to vector<8x128xi32>
    %23 = vector.broadcast %0 : vector<1x128xi32> to vector<8x128xi32>
    %24 = arith.cmpi eq, %22, %23 : vector<8x128xi32>
    %25 = arith.extui %24 : vector<8x128xi1> to vector<8x128xi32>
    %26 = arith.addi %20, %25 : vector<8x128xi32>
    %27 = vector.extract_strided_slice %1 {offsets = [0, 4], sizes = [8, 1], strides = [1, 1]} : vector<8x8xi32> to vector<8x1xi32>
    %28 = vector.broadcast %27 : vector<8x1xi32> to vector<8x128xi32>
    %29 = vector.broadcast %0 : vector<1x128xi32> to vector<8x128xi32>
    %30 = arith.cmpi eq, %28, %29 : vector<8x128xi32>
    %31 = arith.extui %30 : vector<8x128xi1> to vector<8x128xi32>
    %32 = arith.addi %26, %31 : vector<8x128xi32>
    %33 = vector.extract_strided_slice %1 {offsets = [0, 5], sizes = [8, 1], strides = [1, 1]} : vector<8x8xi32> to vector<8x1xi32>
    %34 = vector.broadcast %33 : vector<8x1xi32> to vector<8x128xi32>
    %35 = vector.broadcast %0 : vector<1x128xi32> to vector<8x128xi32>
    %36 = arith.cmpi eq, %34, %35 : vector<8x128xi32>
    %37 = arith.extui %36 : vector<8x128xi1> to vector<8x128xi32>
    %38 = arith.addi %32, %37 : vector<8x128xi32>
    %39 = vector.extract_strided_slice %1 {offsets = [0, 6], sizes = [8, 1], strides = [1, 1]} : vector<8x8xi32> to vector<8x1xi32>
    %40 = vector.broadcast %39 : vector<8x1xi32> to vector<8x128xi32>
    %41 = vector.broadcast %0 : vector<1x128xi32> to vector<8x128xi32>
    %42 = arith.cmpi eq, %40, %41 : vector<8x128xi32>
    %43 = arith.extui %42 : vector<8x128xi1> to vector<8x128xi32>
    %44 = arith.addi %38, %43 : vector<8x128xi32>
    %45 = vector.extract_strided_slice %1 {offsets = [0, 7], sizes = [8, 1], strides = [1, 1]} : vector<8x8xi32> to vector<8x1xi32>
    %46 = vector.broadcast %45 : vector<8x1xi32> to vector<8x128xi32>
    %47 = vector.broadcast %0 : vector<1x128xi32> to vector<8x128xi32>
    %48 = arith.cmpi eq, %46, %47 : vector<8x128xi32>
    %49 = arith.extui %48 : vector<8x128xi1> to vector<8x128xi32>
    %50 = arith.addi %44, %49 : vector<8x128xi32>
    %51 = arith.sitofp %50 : vector<8x128xi32> to vector<8x128xf32>
    %c0_1 = arith.constant 0 : index
    %c0_2 = arith.constant 0 : index
    %52 = vector.load %arg2[%c0_1, %c0_2] : memref<128x128xf32, #tpu.memory_space<vmem>>, vector<128x128xf32>
    %cst = arith.constant dense<0.000000e+00> : vector<8x128xf32>
    %53 = tpu.matmul %51, %52, %cst {dimension_numbers = #tpu.dot_dimension_numbers<[1], [0], [0], [1], [0, 0, 1, 1], [], []>} : vector<8x128xf32>, vector<128x128xf32>, vector<8x128xf32> -> vector<8x128xf32>
    %c0_3 = arith.constant 0 : index
    %c0_4 = arith.constant 0 : index
    %54 = vector.load %arg3[%c0_3, %c0_4] : memref<1x128xf32, #tpu.memory_space<vmem>>, vector<1x128xf32>
    %55 = vector.broadcast %54 : vector<1x128xf32> to vector<8x128xf32>
    %56 = arith.addf %53, %55 : vector<8x128xf32>
    %cst_5 = arith.constant 0.000000e+00 : f32
    %57 = vector.broadcast %cst_5 : f32 to vector<8x128xf32>
    %58 = arith.maximumf %56, %57 : vector<8x128xf32>
    %c0_6 = arith.constant 0 : index
    %c0_7 = arith.constant 0 : index
    %59 = vector.load %arg4[%c0_6, %c0_7] : memref<128x128xf32, #tpu.memory_space<vmem>>, vector<128x128xf32>
    %cst_8 = arith.constant dense<0.000000e+00> : vector<8x128xf32>
    %60 = tpu.matmul %58, %59, %cst_8 {dimension_numbers = #tpu.dot_dimension_numbers<[1], [0], [0], [1], [0, 0, 1, 1], [], []>} : vector<8x128xf32>, vector<128x128xf32>, vector<8x128xf32> -> vector<8x128xf32>
    %c0_9 = arith.constant 0 : index
    %c0_10 = arith.constant 0 : index
    %61 = vector.load %arg5[%c0_9, %c0_10] : memref<1x128xf32, #tpu.memory_space<vmem>>, vector<1x128xf32>
    %62 = vector.broadcast %61 : vector<1x128xf32> to vector<8x128xf32>
    %63 = arith.addf %60, %62 : vector<8x128xf32>
    %64 = tpu.iota {dimensions = array<i32: 1>} : vector<1x128xi32>
    %c32_i32 = arith.constant 32 : i32
    %65 = vector.broadcast %c32_i32 : i32 to vector<1x128xi32>
    %66 = arith.cmpi slt, %64, %65 : vector<1x128xi32>
    %cst_11 = arith.constant -1.000000e+30 : f32
    %67 = vector.shape_cast %66 : vector<1x128xi1> to vector<1x128xi1>
    %68 = vector.broadcast %67 : vector<1x128xi1> to vector<8x128xi1>
    %69 = vector.broadcast %cst_11 : f32 to vector<8x128xf32>
    %70 = arith.select %68, %63, %69 : vector<8x128xi1>, vector<8x128xf32>
    %cst_12 = arith.constant dense<0xFF800000> : vector<8xf32>
    %71 = vector.multi_reduction <maximumf>, %70, %cst_12 [1] : vector<8x128xf32> to vector<8xf32>
    %72 = vector.shape_cast %71 : vector<8xf32> to vector<8x1xf32>
    %73 = vector.broadcast %72 : vector<8x1xf32> to vector<8x128xf32>
    %74 = arith.subf %63, %73 : vector<8x128xf32>
    %75 = math.exp %74 : vector<8x128xf32>
    %cst_13 = arith.constant 0.000000e+00 : f32
    %76 = vector.shape_cast %66 : vector<1x128xi1> to vector<1x128xi1>
    %77 = vector.broadcast %76 : vector<1x128xi1> to vector<8x128xi1>
    %78 = vector.broadcast %cst_13 : f32 to vector<8x128xf32>
    %79 = arith.select %77, %75, %78 : vector<8x128xi1>, vector<8x128xf32>
    %cst_14 = arith.constant dense<0.000000e+00> : vector<8xf32>
    %80 = vector.multi_reduction <add>, %79, %cst_14 [1] : vector<8x128xf32> to vector<8xf32>
    %81 = vector.shape_cast %80 : vector<8xf32> to vector<8x1xf32>
    %82 = math.log %81 : vector<8x1xf32>
    %83 = vector.broadcast %82 : vector<8x1xf32> to vector<8x128xf32>
    %84 = arith.subf %74, %83 : vector<8x128xf32>
    %c0_15 = arith.constant 0 : index
    %c0_16 = arith.constant 0 : index
    %85 = vector.load %arg6[%c0_15, %c0_16] : memref<8x128xf32, #tpu.memory_space<vmem>>, vector<8x128xf32>
    tpu.vector_store %arg6[%c0_15, %c0_16], %84 {strides = array<i32>} : memref<8x128xf32, #tpu.memory_space<vmem>>, vector<8x128xf32>,
    return
  }
  func.func @transform_0(%arg0: i32) -> (i32, i32) {
    %c0_i32 = arith.constant 0 : i32
    %c0_i32_0 = arith.constant 0 : i32
    return %arg0, %c0_i32 : i32, i32
  }
  func.func @transform_1(%arg0: i32) -> (i32, i32) {
    %c0_i32 = arith.constant 0 : i32
    %c0_i32_0 = arith.constant 0 : i32
    %c0_i32_1 = arith.constant 0 : i32
    return %c0_i32, %c0_i32_0 : i32, i32
  }
  func.func @transform_2(%arg0: i32) -> (i32, i32) {
    %c0_i32 = arith.constant 0 : i32
    %c0_i32_0 = arith.constant 0 : i32
    %c0_i32_1 = arith.constant 0 : i32
    return %c0_i32, %c0_i32_0 : i32, i32
  }
  func.func @transform_3(%arg0: i32) -> (i32, i32) {
    %c0_i32 = arith.constant 0 : i32
    %c0_i32_0 = arith.constant 0 : i32
    %c0_i32_1 = arith.constant 0 : i32
    return %c0_i32, %c0_i32_0 : i32, i32
  }
  func.func @transform_4(%arg0: i32) -> (i32, i32) {
    %c0_i32 = arith.constant 0 : i32
    %c0_i32_0 = arith.constant 0 : i32
    %c0_i32_1 = arith.constant 0 : i32
    return %c0_i32, %c0_i32_0 : i32, i32
  }
  func.func @transform_5(%arg0: i32) -> (i32, i32) {
    %c0_i32 = arith.constant 0 : i32
    %c0_i32_0 = arith.constant 0 : i32
    return %arg0, %c0_i32 : i32, i32
  }
}

module attributes {stable_mosaic.version = 11 : i64} {
  func.func @dan_kernel(%arg0: i32, %arg1: memref<8x8xi32, #tpu.memory_space<vmem>>, %arg2: memref<128x128xf32, #tpu.memory_space<vmem>>, %arg3: memref<1x128xf32, #tpu.memory_space<vmem>>, %arg4: memref<128x128xf32, #tpu.memory_space<vmem>>, %arg5: memref<1x128xf32, #tpu.memory_space<vmem>>, %arg6: memref<8x128xf32, #tpu.memory_space<vmem>>) attributes {dimension_semantics = [#tpu.dimension_semantics<parallel>], iteration_bounds = array<i64: 1>, scalar_prefetch = 0 : i64, scratch_operands = 0 : i64, tpu.core_type = #tpu.core_type<tc>, window_params = [{transform_indices = @transform_0, window_bounds = array<i64: 8, 8>}, {pipeline_mode = #tpu.pipeline_mode<synchronous>, transform_indices = @transform_1, window_bounds = array<i64: 128, 128>}, {pipeline_mode = #tpu.pipeline_mode<synchronous>, transform_indices = @transform_2, window_bounds = array<i64: 1, 128>}, {pipeline_mode = #tpu.pipeline_mode<synchronous>, transform_indices = @transform_3, window_bounds = array<i64: 128, 128>}, {pipeline_mode = #tpu.pipeline_mode<synchronous>, transform_indices = @transform_4, window_bounds = array<i64: 1, 128>}, {transform_indices = @transform_5, window_bounds = array<i64: 8, 128>}]} {
    %0 = tpu.iota {dimensions = array<i32: 1>} : vector<1x128xi32>
    %c0 = arith.constant 0 : index
    %c0_0 = arith.constant 0 : index
    %1 = vector.load %arg1[%c0, %c0_0] : memref<8x8xi32, #tpu.memory_space<vmem>>, vector<8x8xi32>
    %c0_i32 = arith.constant 0 : i32
    %2 = vector.broadcast %c0_i32 : i32 to vector<8x128xi32>
    %3 = vector.extract_strided_slice %1 {offsets = [0, 0], sizes = [8, 1], strides = [1, 1]} : vector<8x8xi32> to vector<8x1xi32>
    %4 = vector.broadcast %3 : vector<8x1xi32> to vector<8x128xi32>
    %5 = vector.broadcast %0 : vector<1x128xi32> to vector<8x128xi32>
    %6 = arith.cmpi eq, %4, %5 : vector<8x128xi32>
    %7 = arith.extui %6 : vector<8x128xi1> to vector<8x128xi32>
    %8 = arith.addi %2, %7 : vector<8x128xi32>
    %9 = vector.extract_strided_slice %1 {offsets = [0, 1], sizes = [8, 1], strides = [1, 1]} : vector<8x8xi32> to vector<8x1xi32>
    %10 = vector.broadcast %9 : vector<8x1xi32> to vector<8x128xi32>
    %11 = vector.broadcast %0 : vector<1x128xi32> to vector<8x128xi32>
    %12 = arith.cmpi eq, %10, %11 : vector<8x128xi32>
    %13 = arith.extui %12 : vector<8x128xi1> to vector<8x128xi32>
    %14 = arith.addi %8, %13 : vector<8x128xi32>
    %15 = vector.extract_strided_slice %1 {offsets = [0, 2], sizes = [8, 1], strides = [1, 1]} : vector<8x8xi32> to vector<8x1xi32>
    %16 = vector.broadcast %15 : vector<8x1xi32> to vector<8x128xi32>
    %17 = vector.broadcast %0 : vector<1x128xi32> to vector<8x128xi32>
    %18 = arith.cmpi eq, %16, %17 : vector<8x128xi32>
    %19 = arith.extui %18 : vector<8x128xi1> to vector<8x128xi32>
    %20 = arith.addi %14, %19 : vector<8x128xi32>
    %21 = vector.extract_strided_slice %1 {offsets = [0, 3], sizes = [8, 1], strides = [1, 1]} : vector<8x8xi32> to vector<8x1xi32>
    %22 = vector.broadcast %21 : vector<8x1xi32> to vector<8x128xi32>
    %23 = vector.broadcast %0 : vector<1x128xi32> to vector<8x128xi32>
    %24 = arith.cmpi eq, %22, %23 : vector<8x128xi32>
    %25 = arith.extui %24 : vector<8x128xi1> to vector<8x128xi32>
    %26 = arith.addi %20, %25 : vector<8x128xi32>
    %27 = vector.extract_strided_slice %1 {offsets = [0, 4], sizes = [8, 1], strides = [1, 1]} : vector<8x8xi32> to vector<8x1xi32>
    %28 = vector.broadcast %27 : vector<8x1xi32> to vector<8x128xi32>
    %29 = vector.broadcast %0 : vector<1x128xi32> to vector<8x128xi32>
    %30 = arith.cmpi eq, %28, %29 : vector<8x128xi32>
    %31 = arith.extui %30 : vector<8x128xi1> to vector<8x128xi32>
    %32 = arith.addi %26, %31 : vector<8x128xi32>
    %33 = vector.extract_strided_slice %1 {offsets = [0, 5], sizes = [8, 1], strides = [1, 1]} : vector<8x8xi32> to vector<8x1xi32>
    %34 = vector.broadcast %33 : vector<8x1xi32> to vector<8x128xi32>
    %35 = vector.broadcast %0 : vector<1x128xi32> to vector<8x128xi32>
    %36 = arith.cmpi eq, %34, %35 : vector<8x128xi32>
    %37 = arith.extui %36 : vector<8x128xi1> to vector<8x128xi32>
    %38 = arith.addi %32, %37 : vector<8x128xi32>
    %39 = vector.extract_strided_slice %1 {offsets = [0, 6], sizes = [8, 1], strides = [1, 1]} : vector<8x8xi32> to vector<8x1xi32>
    %40 = vector.broadcast %39 : vector<8x1xi32> to vector<8x128xi32>
    %41 = vector.broadcast %0 : vector<1x128xi32> to vector<8x128xi32>
    %42 = arith.cmpi eq, %40, %41 : vector<8x128xi32>
    %43 = arith.extui %42 : vector<8x128xi1> to vector<8x128xi32>
    %44 = arith.addi %38, %43 : vector<8x128xi32>
    %45 = vector.extract_strided_slice %1 {offsets = [0, 7], sizes = [8, 1], strides = [1, 1]} : vector<8x8xi32> to vector<8x1xi32>
    %46 = vector.broadcast %45 : vector<8x1xi32> to vector<8x128xi32>
    %47 = vector.broadcast %0 : vector<1x128xi32> to vector<8x128xi32>
    %48 = arith.cmpi eq, %46, %47 : vector<8x128xi32>
    %49 = arith.extui %48 : vector<8x128xi1> to vector<8x128xi32>
    %50 = arith.addi %44, %49 : vector<8x128xi32>
    %51 = arith.sitofp %50 : vector<8x128xi32> to vector<8x128xf32>
    %c0_1 = arith.constant 0 : index
    %c0_2 = arith.constant 0 : index
    %52 = vector.load %arg2[%c0_1, %c0_2] : memref<128x128xf32, #tpu.memory_space<vmem>>, vector<128x128xf32>
    %cst = arith.constant dense<0.000000e+00> : vector<8x128xf32>
    %53 = tpu.matmul %51, %52, %cst {dimension_numbers = #tpu.dot_dimension_numbers<[1], [0], [0], [1], [0, 0, 1, 1], [], []>} : vector<8x128xf32>, vector<128x128xf32>, vector<8x128xf32> -> vector<8x128xf32>
    %c0_3 = arith.constant 0 : index
    %c0_4 = arith.constant 0 : index
    %54 = vector.load %arg3[%c0_3, %c0_4] : memref<1x128xf32, #tpu.memory_space<vmem>>, vector<1x128xf32>
    %55 = vector.broadcast %54 : vector<1x128xf32> to vector<8x128xf32>
    %56 = arith.addf %53, %55 : vector<8x128xf32>
    %cst_5 = arith.constant 0.000000e+00 : f32
    %57 = vector.broadcast %cst_5 : f32 to vector<8x128xf32>
    %58 = arith.maximumf %56, %57 : vector<8x128xf32>
    %c0_6 = arith.constant 0 : index
    %c0_7 = arith.constant 0 : index
    %59 = vector.load %arg4[%c0_6, %c0_7] : memref<128x128xf32, #tpu.memory_space<vmem>>, vector<128x128xf32>
    %cst_8 = arith.constant dense<0.000000e+00> : vector<8x128xf32>
    %60 = tpu.matmul %58, %59, %cst_8 {dimension_numbers = #tpu.dot_dimension_numbers<[1], [0], [0], [1], [0, 0, 1, 1], [], []>} : vector<8x128xf32>, vector<128x128xf32>, vector<8x128xf32> -> vector<8x128xf32>
    %c0_9 = arith.constant 0 : index
    %c0_10 = arith.constant 0 : index
    %61 = vector.load %arg5[%c0_9, %c0_10] : memref<1x128xf32, #tpu.memory_space<vmem>>, vector<1x128xf32>
    %62 = vector.broadcast %61 : vector<1x128xf32> to vector<8x128xf32>
    %63 = arith.addf %60, %62 : vector<8x128xf32>
    %64 = tpu.iota {dimensions = array<i32: 1>} : vector<1x128xi32>
    %c32_i32 = arith.constant 32 : i32
    %65 = vector.broadcast %c32_i32 : i32 to vector<1x128xi32>
    %66 = arith.cmpi slt, %64, %65 : vector<1x128xi32>
    %cst_11 = arith.constant -1.000000e+30 : f32
    %67 = vector.shape_cast %66 : vector<1x128xi1> to vector<1x128xi1>
    %68 = vector.broadcast %67 : vector<1x128xi1> to vector<8x128xi1>
    %69 = vector.broadcast %cst_11 : f32 to vector<8x128xf32>
    %70 = arith.select %68, %63, %69 : vector<8x128xi1>, vector<8x128xf32>
    %cst_12 = arith.constant dense<0xFF800000> : vector<8xf32>
    %71 = vector.multi_reduction <maximumf>, %70, %cst_12 [1] : vector<8x128xf32> to vector<8xf32>
    %72 = vector.shape_cast %71 : vector<8xf32> to vector<8x1xf32>
    %73 = vector.broadcast %72 : vector<8x1xf32> to vector<8x128xf32>
    %74 = arith.subf %63, %73 : vector<8x128xf32>
    %75 = math.exp %74 : vector<8x128xf32>
    %cst_13 = arith.constant 0.000000e+00 : f32
    %76 = vector.shape_cast %66 : vector<1x128xi1> to vector<1x128xi1>
    %77 = vector.broadcast %76 : vector<1x128xi1> to vector<8x128xi1>
    %78 = vector.broadcast %cst_13 : f32 to vector<8x128xf32>
    %79 = arith.select %77, %75, %78 : vector<8x128xi1>, vector<8x128xf32>
    %cst_14 = arith.constant dense<0.000000e+00> : vector<8xf32>
    %80 = vector.multi_reduction <add>, %79, %cst_14 [1] : vector<8x128xf32> to vector<8xf32>
    %81 = vector.shape_cast %80 : vector<8xf32> to vector<8x1xf32>
    %82 = math.log %81 : vector<8x1xf32>
    %83 = vector.broadcast %82 : vector<8x1xf32> to vector<8x128xf32>
    %84 = arith.subf %74, %83 : vector<8x128xf32>
    %c0_15 = arith.constant 0 : index
    %c0_16 = arith.constant 0 : index
    %85 = vector.load %arg6[%c0_15, %c0_16] : memref<8x128xf32, #tpu.memory_space<vmem>>, vector<8x128xf32>
    tpu.vector_store %arg6[%c0_15, %c0_16], %84 {strides = array<i32>} : memref<8x128xf32, #tpu.memory_space<vmem>>, vector<8x128xf32>,
    return
  }
  func.func @transform_0(%arg0: i32) -> (i32, i32) {
    %c0_i32 = arith.constant 0 : i32
    %c0_i32_0 = arith.constant 0 : i32
    return %arg0, %c0_i32 : i32, i32
  }
  func.func @transform_1(%arg0: i32) -> (i32, i32) {
    %c0_i32 = arith.constant 0 : i32
    %c0_i32_0 = arith.constant 0 : i32
    %c0_i32_1 = arith.constant 0 : i32
    return %c0_i32, %c0_i32_0 : i32, i32
  }
  func.func @transform_2(%arg0: i32) -> (i32, i32) {
    %c0_i32 = arith.constant 0 : i32
    %c0_i32_0 = arith.constant 0 : i32
    %c0_i32_1 = arith.constant 0 : i32
    return %c0_i32, %c0_i32_0 : i32, i32
  }
  func.func @transform_3(%arg0: i32) -> (i32, i32) {
    %c0_i32 = arith.constant 0 : i32
    %c0_i32_0 = arith.constant 0 : i32
    %c0_i32_1 = arith.constant 0 : i32
    return %c0_i32, %c0_i32_0 : i32, i32
  }
  func.func @transform_4(%arg0: i32) -> (i32, i32) {
    %c0_i32 = arith.constant 0 : i32
    %c0_i32_0 = arith.constant 0 : i32
    %c0_i32_1 = arith.constant 0 : i32
    return %c0_i32, %c0_i32_0 : i32, i32
  }
  func.func @transform_5(%arg0: i32) -> (i32, i32) {
    %c0_i32 = arith.constant 0 : i32
    %c0_i32_0 = arith.constant 0 : i32
    return %arg0, %c0_i32 : i32, i32
  }
}

</mosaic_0001>

<bundles_post_ra>
// kernel: tpu_custom_call.1
= control target key start
LH: loop header
LB: loop body
LE: loop exit
PB: predicated region body
PF: predicated region fallthrough
CT: control target
= control target key end

     0   :  { %10 = vsyncpa [#allocation3], 0  ;;  %s658_s0 = inlined_call_operand.hbm [shape: s32[8,8], index: 0, kind: input, shape index: {}]   ;;  %s659_s1 = inlined_call_operand.hbm [shape: f32[128,128], index: 1, kind: input, shape index: {}]   ;;  %s660_s2 = inlined_call_operand.vmem [shape: f32[1,128], index: 2, kind: input, shape index: {}]   ;;  %s661_s3 = inlined_call_operand.hbm [shape: f32[128,128], index: 3, kind: input, shape index: {}]   ;;  %s662_s4 = inlined_call_operand.vmem [shape: f32[1,128], index: 4, kind: input, shape index: {}]   ;;  %s663_s5 = inlined_call_operand.hbm [shape: f32[8,128], index: 5, kind: output, shape index: {}]  }
   0x1   :  { %11 = vsyncpa [#allocation6], 0 }
   0x2   :  { %12 = vsyncpa [#allocation4], 0  ;;  %s551_s18 = smov [#allocation5]  }
   0x3   :  { %s28_s19 = sshll.u32 %s551_s18, 4  ;;  %s29_s19 = int_to_ptr.vmem [resolvable:$true] %s28_s19 }
   0x4   :  { %s473_s20 = scalar_lea.vmem %s29_s19, 2048  ;;  %p478_p1 = scmp.lt.s32.totalorder %s29_s19, %s29_s19 }
   0x5   :  { %p474_p0 = scmp.ne.s32.totalorder %s29_s19, %s473_s20  ;;  %p479_p2 = scmp.lt.s32.totalorder %s473_s20, %s473_s20 }
   0x7   :  { %p480_p3 = por %p479_p2, %p478_p1 }
   0x9   :  { %p481_p4 = pnand %p480_p3, %p474_p0 }
   0xb   :  { %484 = shalt.err (!%p481_p4)
}
   0xc   :  { %s552_s21 = smov 128   ;;  %s553_s22 = smov 8  }
   0xd   :  { %34 = dma.hbm_to_vmem [thread:$0]  %s659_s1, 2048, %s29_s19, [#allocation6], %s552_s21, %s552_s21, %s553_s22  }
   0xe   :  { %s554_s25 = smov [#allocation2]   ;;  %s555_s27 = smov [#allocation7]  }
   0xf   :  { %s19_s26 = sshll.u32 %s554_s25, 4  ;;  %s42_s28 = sshll.u32 %s555_s27, 4  ;;  %s20_s26 = int_to_ptr.vmem [resolvable:$true] %s19_s26  ;;  %s43_s28 = int_to_ptr.vmem [resolvable:$true] %s42_s28 }
  0x10   :  { %s493_s29 = scalar_lea.vmem %s20_s26, 128  ;;  %p498_p6 = scmp.lt.s32.totalorder %s20_s26, %s20_s26 }
  0x11   :  { %p494_p5 = scmp.ne.s32.totalorder %s20_s26, %s493_s29  ;;  %p499_p7 = scmp.lt.s32.totalorder %s493_s29, %s493_s29 }
  0x13   :  { %p500_p8 = por %p499_p7, %p498_p6 }
  0x15   :  { %p501_p9 = pnand %p500_p8, %p494_p5 }
  0x17   :  { %504 = shalt.err (!%p501_p9)
}
  0x18   :  { %22 = dma.hbm_to_vmem [thread:$0]  %s658_s0, 128, %s20_s26, [#allocation3]  }
  0x19   :  { %s513_s7 = scalar_lea.vmem %s43_s28, 2048  ;;  %p518_p11 = scmp.lt.s32.totalorder %s43_s28, %s43_s28 }
  0x1a   :  { %p514_p10 = scmp.ne.s32.totalorder %s43_s28, %s513_s7  ;;  %p519_p12 = scmp.lt.s32.totalorder %s513_s7, %s513_s7 }
  0x1c   :  { %p520_p13 = por %p519_p12, %p518_p11 }
  0x1e   :  { %p521_p0 = pnand %p520_p13, %p514_p10 }
  0x20   :  { %524 = shalt.err (!%p521_p0)
}
  0x21   :  { %48 = dma.hbm_to_vmem [thread:$0]  %s661_s3, 2048, %s43_s28, [#allocation6], %s552_s21, %s552_s21, %s553_s22  }
  0x22   :  { %545 = dma.done.wait [#allocation3], 128  }
  0x23   :  { %546 = vsyncadd [#allocation3], 4294967168 }
  0x24   :  { %547 = dma.done.wait [#allocation6], 4096  }
  0x25   :  { %548 = vsyncadd [#allocation6], 4294963200  ;;  %v556_v0 = vmov 2   ;;  %v557_v1 = vmov 0   ;;  %v558_v2 = vmov 0.0   ;;  %v62_v3 = vld [vmem:[#allocation2] sm:$0xff]  ;;  %v60_v39 = vlaneseq }
  0x26   :  { %454 = vset.pattern.permute.xlu1 %v556_v0  ;;  %452 = vset.pattern.permute.xlu0 %v557_v1  ;;  %v126_v4 = vld [vmem:[#allocation5 + $0x78] sm:$0xff]  ;;  %v125_v5 = vld [vmem:[#allocation5 + $0x70] sm:$0xff]  ;;  %v559_v6 = vmov 3   ;;  %v560_v7 = vmov 1   ;;  %v124_v8 = vld [vmem:[#allocation5 + $0x68] sm:$0xff]  ;;  %v561_v10 = vmov 4  }
  0x27   :  { %366 = vmatprep.subr.mxu0 %v558_v2  ;;  %401 = vmatprep.subr.mxu1 %v558_v2  ;;  %v123_v9 = vld [vmem:[#allocation5 + $0x60] sm:$0xff]  ;;  %v562_v11 = vmov 5   ;;  %v122_v12 = vld [vmem:[#allocation5 + $0x58] sm:$0xff]  ;;  %v121_v13 = vld [vmem:[#allocation5 + $0x50] sm:$0xff]  ;;  %v563_v14 = vmov 6   ;;  %v564_v17 = vmov 7  }
  0x28   :  { %75 = vperm.xlu1 %454, %v62_v3   ;;  %64 = vperm.xlu0 %452, %v62_v3   ;;  %v120_v15 = vld [vmem:[#allocation5 + $0x48] sm:$0xff]  ;;  %v119_v16 = vld [vmem:[#allocation5 + $0x40] sm:$0xff]  ;;  %v118_v18 = vld [vmem:[#allocation5 + $0x38] sm:$0xff]  ;;  %vm565_vm0 = vmmov 0   ;;  %v61_v42 = vand.u32 127, %v60_v39 }
  0x29   :  { %367 = vmatpush3.msra.mxu0 %v126_v4  ;;  %v117_v19 = vld [vmem:[#allocation5 + $0x30] sm:$0xff]  ;;  %398 = vmatprep.mubr.msk.f32.mxu0 %vm565_vm0, %v558_v2  ;;  %v116_v20 = vld [vmem:[#allocation5 + $0x28] sm:$0xff]  ;;  %v220_v21 = vld [vmem:[#allocation7 + $0x78] sm:$0xff] }
  0x2a   :  { %368 = vmatprep.subr.mxu0 %v558_v2  ;;  %v219_v22 = vld [vmem:[#allocation7 + $0x70] sm:$0xff]  ;;  %433 = vmatprep.mubr.msk.f32.mxu1 %vm565_vm0, %v558_v2  ;;  %v115_v23 = vld [vmem:[#allocation5 + $0x20] sm:$0xff]  ;;  %v218_v24 = vld [vmem:[#allocation7 + $0x68] sm:$0xff]  ;;  %vm298_vm9 = vcmp.lt.s32.totalorder %v61_v42, 32 }
  0x2b   :  { %369 = vmatpush3.msra.mxu0 %v125_v5  ;;  %402 = vmatpush3.msra.mxu1 %v220_v21  ;;  %v114_v25 = vld [vmem:[#allocation5 + $0x18] sm:$0xff]  ;;  %v217_v26 = vld [vmem:[#allocation7 + $0x60] sm:$0xff]  ;;  %v113_v27 = vld [vmem:[#allocation5 + $0x10] sm:$0xff] }
  0x2c   :  { %455 = vset.pattern.permute.xlu1 %v559_v6  ;;  %453 = vset.pattern.permute.xlu0 %v560_v7  ;;  %v216_v28 = vld [vmem:[#allocation7 + $0x58] sm:$0xff]  ;;  %v112_v29 = vld [vmem:[#allocation5 + $0x8] sm:$0xff]  ;;  %v215_v30 = vld [vmem:[#allocation7 + $0x50] sm:$0xff] }
  0x2d   :  { %81 = vperm.xlu1 %455, %v62_v3   ;;  %69 = vperm.xlu0 %453, %v62_v3   ;;  %v111_v31 = vld [vmem:[#allocation5] sm:$0xff]  ;;  %v214_v32 = vld [vmem:[#allocation7 + $0x48] sm:$0xff]  ;;  %v212_v34 = vld [vmem:[#allocation7 + $0x38] sm:$0xff] }
  0x2e   :  { %370 = vmatprep.subr.mxu0 %v558_v2  ;;  %403 = vmatprep.subr.mxu1 %v558_v2  ;;  %v213_v33 = vld [vmem:[#allocation7 + $0x40] sm:$0xff]  ;;  %v211_v35 = vld [vmem:[#allocation7 + $0x30] sm:$0xff]  ;;  %v210_v36 = vld [vmem:[#allocation7 + $0x28] sm:$0xff] }
  0x2f   :  { %371 = vmatpush3.msra.mxu0 %v124_v8  ;;  %404 = vmatpush3.msra.mxu1 %v219_v22  ;;  %v209_v37 = vld [vmem:[#allocation7 + $0x20] sm:$0xff]  ;;  %v208_v38 = vld [vmem:[#allocation7 + $0x18] sm:$0xff]  ;;  %v206_v4 = vld [vmem:[#allocation7 + $0x8] sm:$0xff] }
  0x30   :  { %372 = vmatprep.subr.mxu0 %v558_v2  ;;  %405 = vmatprep.subr.mxu1 %v558_v2  ;;  %v205_v5 = vld [vmem:[#allocation7] sm:$0xff]  ;;  %v330_v6 = vld [vmem:[%s660_s2] ss:$0 sm:$0xff]  ;;  %s566_s2 = smov [#allocation8]  }
  0x31   :  { %456 = vset.pattern.permute.xlu1 %v561_v10  ;;  %457 = vset.pattern.permute.xlu0 %v562_v11  ;;  %v331_v10 = vld [vmem:[%s662_s4] ss:$0 sm:$0xff]  ;;  %s320_s11 = sshll.u32 %s566_s2, 4  ;;  %s321_s11 = int_to_ptr.vmem [resolvable:$true] %s320_s11 }
  0x32   :  { %87 = vperm.xlu1 %456, %v62_v3   ;;  %93 = vperm.xlu0 %457, %v62_v3   ;;  %s525_s4 = scalar_lea.vmem %s321_s11, 128  ;;  %p530_p2 = scmp.lt.s32.totalorder %s321_s11, %s321_s11 }
  0x33   :  { %373 = vmatpush3.msra.mxu0 %v123_v9  ;;  %406 = vmatpush3.msra.mxu1 %v218_v24  ;;  %p526_p1 = scmp.ne.s32.totalorder %s321_s11, %s525_s4  ;;  %p531_p3 = scmp.lt.s32.totalorder %s525_s4, %s525_s4 }
  0x34   :  { %374 = vmatprep.subr.mxu0 %v558_v2  ;;  %407 = vmatprep.subr.mxu1 %v558_v2 }
  0x35   :  { %375 = vmatpush3.msra.mxu0 %v122_v12  ;;  %408 = vmatpush3.msra.mxu1 %v217_v26  ;;  %p532_p4 = por %p531_p3, %p530_p2 }
  0x36   :  { %458 = vset.pattern.permute.xlu1 %v563_v14  ;;  %376 = vmatprep.subr.mxu0 %v558_v2 }
  0x37   :  { %99 = vperm.xlu1 %458, %v62_v3   ;;  %377 = vmatpush3.msra.mxu0 %v121_v13  ;;  %p533_p5 = pnand %p532_p4, %p526_p1 }
  0x38   :  { %378 = vmatprep.subr.mxu0 %v558_v2  ;;  %460 = vset.pattern.permute.xlu0 %v564_v17 }
  0x39   :  { %379 = vmatpush3.msra.mxu0 %v120_v15  ;;  %409 = vmatprep.subr.mxu1 %v558_v2 }
  0x3a   :  { %380 = vmatprep.subr.mxu0 %v558_v2  ;;  %410 = vmatpush3.msra.mxu1 %v216_v28 }
  0x3b   :  { %459 = vset.pattern.permute.xlu1 %v564_v17  ;;  %381 = vmatpush3.msra.mxu0 %v119_v16 }
  0x3c   :  { %105 = vperm.xlu1 %459, %v62_v3   ;;  %382 = vmatprep.subr.mxu0 %v558_v2  ;;  %v207_v3 = vld [vmem:[#allocation7 + $0x10] sm:$0xff] }
  0x3d   :  { %383 = vmatpush3.msra.mxu0 %v118_v18  ;;  %411 = vmatprep.subr.mxu1 %v558_v2 }
  0x3e   :  { %384 = vmatprep.subr.mxu0 %v558_v2  ;;  %412 = vmatpush3.msra.mxu1 %v215_v30 }
  0x3f   :  { %385 = vmatpush3.msra.mxu0 %v117_v19  ;;  %413 = vmatprep.subr.mxu1 %v558_v2 }
  0x40   :  { %386 = vmatprep.subr.mxu0 %v558_v2  ;;  %414 = vmatpush3.msra.mxu1 %v214_v32 }
  0x41   :  { %387 = vmatpush3.msra.mxu0 %v116_v20  ;;  %415 = vmatprep.subr.mxu1 %v558_v2 }
  0x42   :  { %388 = vmatprep.subr.mxu0 %v558_v2  ;;  %416 = vmatpush3.msra.mxu1 %v213_v33 }
  0x43   :  { %389 = vmatpush3.msra.mxu0 %v115_v23  ;;  %417 = vmatprep.subr.mxu1 %v558_v2 }
  0x44   :  { %390 = vmatprep.subr.mxu0 %v558_v2  ;;  %418 = vmatpush3.msra.mxu1 %v212_v34 }
  0x45   :  { %391 = vmatpush3.msra.mxu0 %v114_v25  ;;  %419 = vmatprep.subr.mxu1 %v558_v2 }
  0x46   :  { %392 = vmatprep.subr.mxu0 %v558_v2  ;;  %420 = vmatpush3.msra.mxu1 %v211_v35 }
  0x47   :  { %393 = vmatpush3.msra.mxu0 %v113_v27  ;;  %421 = vmatprep.subr.mxu1 %v558_v2 }
  0x48   :  { %394 = vmatprep.subr.mxu0 %v558_v2  ;;  %422 = vmatpush3.msra.mxu1 %v210_v36 }
  0x49   :  { %395 = vmatpush3.msra.mxu0 %v112_v29  ;;  %423 = vmatprep.subr.mxu1 %v558_v2 }
  0x4a   :  { %396 = vmatprep.subr.mxu0 %v558_v2  ;;  %424 = vmatpush3.msra.mxu1 %v209_v37 }
  0x4b   :  { %397 = vmatpush3.msra.mxu0 %v111_v31  ;;  %425 = vmatprep.subr.mxu1 %v558_v2 }
  0x4c   :  { %426 = vmatpush3.msra.mxu1 %v208_v38 }
  0x4d   :  { %427 = vmatprep.subr.mxu1 %v558_v2 }
  0x4e   :  { %428 = vmatpush3.msra.mxu1 %v207_v3 }
  0x4f   :  { %429 = vmatprep.subr.mxu1 %v558_v2 }
  0x50   :  { %430 = vmatpush3.msra.mxu1 %v206_v4 }
  0x51   :  { %431 = vmatprep.subr.mxu1 %v558_v2 }
  0x52   :  { %432 = vmatpush3.msra.mxu1 %v205_v5 }
  0xa3   :  { %v76_v40 = vpop.permute.xlu1 %75  ;;  %v65_v41 = vpop.permute.xlu0 %64 }
  0xa4   :  { %vm66_vm1 = vcmp.eq.s32.totalorder %v65_v41, %v61_v42  ;;  %vm77_vm2 = vcmp.eq.s32.totalorder %v76_v40, %v61_v42 }
  0xa5   :  { %v67_v45 = vsel %vm66_vm1, 1, %v557_v1  ;;  %v78_v48 = vsel %vm77_vm2, 1, %v557_v1 }
  0xa8   :  { %v82_v43 = vpop.permute.xlu1 %81  ;;  %v70_v44 = vpop.permute.xlu0 %69 }
  0xa9   :  { %vm71_vm3 = vcmp.eq.s32.totalorder %v70_v44, %v61_v42  ;;  %vm83_vm4 = vcmp.eq.s32.totalorder %v82_v43, %v61_v42 }
  0xaa   :  { %v72_v46 = vsel %vm71_vm3, 1, %v557_v1  ;;  %v84_v52 = vsel %vm83_vm4, 1, %v557_v1 }
  0xab   :  { %v73_v47 = vadd.s32 %v72_v46, %v67_v45 }
  0xad   :  { %v79_v49 = vadd.s32 %v78_v48, %v73_v47  ;;  %v88_v50 = vpop.permute.xlu1 %87  ;;  %v94_v51 = vpop.permute.xlu0 %93 }
  0xae   :  { %vm89_vm5 = vcmp.eq.s32.totalorder %v88_v50, %v61_v42  ;;  %vm95_vm6 = vcmp.eq.s32.totalorder %v94_v51, %v61_v42 }
  0xaf   :  { %v85_v53 = vadd.s32 %v84_v52, %v79_v49  ;;  %v90_v54 = vsel %vm89_vm5, 1, %v557_v1  ;;  %v96_v56 = vsel %vm95_vm6, 1, %v557_v1 }
  0xb1   :  { %v91_v55 = vadd.s32 %v90_v54, %v85_v53 }
  0xb2   :  { %v100_v57 = vpop.permute.xlu1 %99 }
  0xb3   :  { %vm101_vm7 = vcmp.eq.s32.totalorder %v100_v57, %v61_v42  ;;  %v97_v58 = vadd.s32 %v96_v56, %v91_v55 }
  0xb4   :  { %v102_v59 = vsel %vm101_vm7, 1, %v557_v1 }
  0xb5   :  { %v103_v61 = vadd.s32 %v102_v59, %v97_v58 }
  0xb7   :  { %v106_v60 = vpop.permute.xlu1 %105 }
  0xb8   :  { %vm107_vm8 = vcmp.eq.s32.totalorder %v106_v60, %v61_v42 }
  0xb9   :  { %v108_v62 = vsel %vm107_vm8, 1, %v557_v1 }
  0xba   :  { %v109_v63 = vadd.s32 %v108_v62, %v103_v61 }
  0xbc   :  { %v110_v0 = vcvt.s32.f32 %v109_v63 }
  0xbe   :  { %399 = vmatmul.mubr.f32.vlgmr.msra.gmra.mxu0 %v110_v0 }
 0x17e   :  { %v200_v7 = vpop.f32.mrf.mxu0 }
 0x17f   :  { %v201_v8 = vadd.f32 %v330_v6, %v200_v7 }
 0x180   :  { %v400_v1 = vpop.f32.mrf.mxu0 }
 0x181   :  { %v204_v9 = vmax.f32 %v201_v8, 0.0 }
 0x183   :  { %434 = vmatmul.mubr.f32.vlgmr.msra.gmra.mxu1 %v204_v9 }
 0x243   :  { %v294_v11 = vpop.f32.mrf.mxu1 }
 0x244   :  { %v295_v12 = vadd.f32 %v331_v10, %v294_v11 }
 0x245   :  { %v435_v13 = vpop.f32.mrf.mxu1 }
 0x246   :  { %v301_v2 = vsel %vm298_vm9, %v295_v12, -1e+30 }
 0x247   :  { %302 = vmax.xlane.f32.xlu0 %v301_v2 }
 0x2d0   :  { %v303_v14 = vpop.xlane.xlu0 %302 }
 0x2d1   :  { %v304_v15 = vsub.f32 %v295_v12, %v303_v14 }
 0x2d3   :  { %v305_v16 = vmul.f32 1.442695, %v304_v15 }
 0x2d5   :  { %461 = vpow2.f32 %v305_v16 }
 0x2e2   :  { %v462_v17 = vpop.eup %461 }
 0x2e3   :  { %v307_v18 = vsel %vm298_vm9, %v462_v17, 0.0 }
 0x2e4   :  { %308 = vadd.xlane.f32.xlu1 %v307_v18 }
 0x36d   :  { %v309_v19 = vpop.xlane.xlu1 %308 }
 0x36e   :  { %463 = vlog2.f32 %v309_v19 }
 0x37b   :  { %v464_v20 = vpop.eup %463 }
 0x37c   :  { %v311_v21 = vmul.f32 0.6931472, %v464_v20 }
 0x37e   :  { %v312_v22 = vsub.f32 %v304_v15, %v311_v21 }
 0x380   :  { %313 = vst [vmem:[#allocation8] sm:$0xff] %v312_v22 }
 0x381   :  { %536 = shalt.err (!%p533_p5)
}
 0x382   :  { %323 = dma.vmem_to_hbm [thread:$0]  %s321_s11, 128, %s663_s5, [#allocation4]  }
 0x383   :  { %549 = dma.done.wait [#allocation4], 128  }
 0x384   :  { %550 = vsyncadd [#allocation4], 4294967168 }
 0x385   :  { %327 = vsyncpa [#allocation3], 1 }
 0x386   :  { %328 = vsyncpa [#allocation6], 1 }
 0x387   :  { %329 = vsyncpa [#allocation4], 1 }

// kernel: tpu_custom_call.1
= control target key start
LH: loop header
LB: loop body
LE: loop exit
PB: predicated region body
PF: predicated region fallthrough
CT: control target
= control target key end

     0   :  { %10 = vsyncpa [#allocation3], 0  ;;  %s658_s0 = inlined_call_operand.hbm [shape: s32[8,8], index: 0, kind: input, shape index: {}]   ;;  %s659_s1 = inlined_call_operand.hbm [shape: f32[128,128], index: 1, kind: input, shape index: {}]   ;;  %s660_s2 = inlined_call_operand.vmem [shape: f32[1,128], index: 2, kind: input, shape index: {}]   ;;  %s661_s3 = inlined_call_operand.hbm [shape: f32[128,128], index: 3, kind: input, shape index: {}]   ;;  %s662_s4 = inlined_call_operand.vmem [shape: f32[1,128], index: 4, kind: input, shape index: {}]   ;;  %s663_s5 = inlined_call_operand.hbm [shape: f32[8,128], index: 5, kind: output, shape index: {}]  }
   0x1   :  { %11 = vsyncpa [#allocation6], 0 }
   0x2   :  { %12 = vsyncpa [#allocation4], 0  ;;  %s551_s18 = smov [#allocation5]  }
   0x3   :  { %s28_s19 = sshll.u32 %s551_s18, 4  ;;  %s29_s19 = int_to_ptr.vmem [resolvable:$true] %s28_s19 }
   0x4   :  { %s473_s20 = scalar_lea.vmem %s29_s19, 2048  ;;  %p478_p1 = scmp.lt.s32.totalorder %s29_s19, %s29_s19 }
   0x5   :  { %p474_p0 = scmp.ne.s32.totalorder %s29_s19, %s473_s20  ;;  %p479_p2 = scmp.lt.s32.totalorder %s473_s20, %s473_s20 }
   0x7   :  { %p480_p3 = por %p479_p2, %p478_p1 }
   0x9   :  { %p481_p4 = pnand %p480_p3, %p474_p0 }
   0xb   :  { %484 = shalt.err (!%p481_p4)
}
   0xc   :  { %s552_s21 = smov 128   ;;  %s553_s22 = smov 8  }
   0xd   :  { %34 = dma.hbm_to_vmem [thread:$0]  %s659_s1, 2048, %s29_s19, [#allocation6], %s552_s21, %s552_s21, %s553_s22  }
   0xe   :  { %s554_s25 = smov [#allocation2]   ;;  %s555_s27 = smov [#allocation7]  }
   0xf   :  { %s19_s26 = sshll.u32 %s554_s25, 4  ;;  %s42_s28 = sshll.u32 %s555_s27, 4  ;;  %s20_s26 = int_to_ptr.vmem [resolvable:$true] %s19_s26  ;;  %s43_s28 = int_to_ptr.vmem [resolvable:$true] %s42_s28 }
  0x10   :  { %s493_s29 = scalar_lea.vmem %s20_s26, 128  ;;  %p498_p6 = scmp.lt.s32.totalorder %s20_s26, %s20_s26 }
  0x11   :  { %p494_p5 = scmp.ne.s32.totalorder %s20_s26, %s493_s29  ;;  %p499_p7 = scmp.lt.s32.totalorder %s493_s29, %s493_s29 }
  0x13   :  { %p500_p8 = por %p499_p7, %p498_p6 }
  0x15   :  { %p501_p9 = pnand %p500_p8, %p494_p5 }
  0x17   :  { %504 = shalt.err (!%p501_p9)
}
  0x18   :  { %22 = dma.hbm_to_vmem [thread:$0]  %s658_s0, 128, %s20_s26, [#allocation3]  }
  0x19   :  { %s513_s7 = scalar_lea.vmem %s43_s28, 2048  ;;  %p518_p11 = scmp.lt.s32.totalorder %s43_s28, %s43_s28 }
  0x1a   :  { %p514_p10 = scmp.ne.s32.totalorder %s43_s28, %s513_s7  ;;  %p519_p12 = scmp.lt.s32.totalorder %s513_s7, %s513_s7 }
  0x1c   :  { %p520_p13 = por %p519_p12, %p518_p11 }
  0x1e   :  { %p521_p0 = pnand %p520_p13, %p514_p10 }
  0x20   :  { %524 = shalt.err (!%p521_p0)
}
  0x21   :  { %48 = dma.hbm_to_vmem [thread:$0]  %s661_s3, 2048, %s43_s28, [#allocation6], %s552_s21, %s552_s21, %s553_s22  }
  0x22   :  { %545 = dma.done.wait [#allocation3], 128  }
  0x23   :  { %546 = vsyncadd [#allocation3], 4294967168 }
  0x24   :  { %547 = dma.done.wait [#allocation6], 4096  }
  0x25   :  { %548 = vsyncadd [#allocation6], 4294963200  ;;  %v556_v0 = vmov 2   ;;  %v557_v1 = vmov 0   ;;  %v558_v2 = vmov 0.0   ;;  %v62_v3 = vld [vmem:[#allocation2] sm:$0xff]  ;;  %v60_v39 = vlaneseq }
  0x26   :  { %454 = vset.pattern.permute.xlu1 %v556_v0  ;;  %452 = vset.pattern.permute.xlu0 %v557_v1  ;;  %v126_v4 = vld [vmem:[#allocation5 + $0x78] sm:$0xff]  ;;  %v125_v5 = vld [vmem:[#allocation5 + $0x70] sm:$0xff]  ;;  %v559_v6 = vmov 3   ;;  %v560_v7 = vmov 1   ;;  %v124_v8 = vld [vmem:[#allocation5 + $0x68] sm:$0xff]  ;;  %v561_v10 = vmov 4  }
  0x27   :  { %366 = vmatprep.subr.mxu0 %v558_v2  ;;  %401 = vmatprep.subr.mxu1 %v558_v2  ;;  %v123_v9 = vld [vmem:[#allocation5 + $0x60] sm:$0xff]  ;;  %v562_v11 = vmov 5   ;;  %v122_v12 = vld [vmem:[#allocation5 + $0x58] sm:$0xff]  ;;  %v121_v13 = vld [vmem:[#allocation5 + $0x50] sm:$0xff]  ;;  %v563_v14 = vmov 6   ;;  %v564_v17 = vmov 7  }
  0x28   :  { %75 = vperm.xlu1 %454, %v62_v3   ;;  %64 = vperm.xlu0 %452, %v62_v3   ;;  %v120_v15 = vld [vmem:[#allocation5 + $0x48] sm:$0xff]  ;;  %v119_v16 = vld [vmem:[#allocation5 + $0x40] sm:$0xff]  ;;  %v118_v18 = vld [vmem:[#allocation5 + $0x38] sm:$0xff]  ;;  %vm565_vm0 = vmmov 0   ;;  %v61_v42 = vand.u32 127, %v60_v39 }
  0x29   :  { %367 = vmatpush3.msra.mxu0 %v126_v4  ;;  %v117_v19 = vld [vmem:[#allocation5 + $0x30] sm:$0xff]  ;;  %398 = vmatprep.mubr.msk.f32.mxu0 %vm565_vm0, %v558_v2  ;;  %v116_v20 = vld [vmem:[#allocation5 + $0x28] sm:$0xff]  ;;  %v220_v21 = vld [vmem:[#allocation7 + $0x78] sm:$0xff] }
  0x2a   :  { %368 = vmatprep.subr.mxu0 %v558_v2  ;;  %v219_v22 = vld [vmem:[#allocation7 + $0x70] sm:$0xff]  ;;  %433 = vmatprep.mubr.msk.f32.mxu1 %vm565_vm0, %v558_v2  ;;  %v115_v23 = vld [vmem:[#allocation5 + $0x20] sm:$0xff]  ;;  %v218_v24 = vld [vmem:[#allocation7 + $0x68] sm:$0xff]  ;;  %vm298_vm9 = vcmp.lt.s32.totalorder %v61_v42, 32 }
  0x2b   :  { %369 = vmatpush3.msra.mxu0 %v125_v5  ;;  %402 = vmatpush3.msra.mxu1 %v220_v21  ;;  %v114_v25 = vld [vmem:[#allocation5 + $0x18] sm:$0xff]  ;;  %v217_v26 = vld [vmem:[#allocation7 + $0x60] sm:$0xff]  ;;  %v113_v27 = vld [vmem:[#allocation5 + $0x10] sm:$0xff] }
  0x2c   :  { %455 = vset.pattern.permute.xlu1 %v559_v6  ;;  %453 = vset.pattern.permute.xlu0 %v560_v7  ;;  %v216_v28 = vld [vmem:[#allocation7 + $0x58] sm:$0xff]  ;;  %v112_v29 = vld [vmem:[#allocation5 + $0x8] sm:$0xff]  ;;  %v215_v30 = vld [vmem:[#allocation7 + $0x50] sm:$0xff] }
  0x2d   :  { %81 = vperm.xlu1 %455, %v62_v3   ;;  %69 = vperm.xlu0 %453, %v62_v3   ;;  %v111_v31 = vld [vmem:[#allocation5] sm:$0xff]  ;;  %v214_v32 = vld [vmem:[#allocation7 + $0x48] sm:$0xff]  ;;  %v212_v34 = vld [vmem:[#allocation7 + $0x38] sm:$0xff] }
  0x2e   :  { %370 = vmatprep.subr.mxu0 %v558_v2  ;;  %403 = vmatprep.subr.mxu1 %v558_v2  ;;  %v213_v33 = vld [vmem:[#allocation7 + $0x40] sm:$0xff]  ;;  %v211_v35 = vld [vmem:[#allocation7 + $0x30] sm:$0xff]  ;;  %v210_v36 = vld [vmem:[#allocation7 + $0x28] sm:$0xff] }
  0x2f   :  { %371 = vmatpush3.msra.mxu0 %v124_v8  ;;  %404 = vmatpush3.msra.mxu1 %v219_v22  ;;  %v209_v37 = vld [vmem:[#allocation7 + $0x20] sm:$0xff]  ;;  %v208_v38 = vld [vmem:[#allocation7 + $0x18] sm:$0xff]  ;;  %v206_v4 = vld [vmem:[#allocation7 + $0x8] sm:$0xff] }
  0x30   :  { %372 = vmatprep.subr.mxu0 %v558_v2  ;;  %405 = vmatprep.subr.mxu1 %v558_v2  ;;  %v205_v5 = vld [vmem:[#allocation7] sm:$0xff]  ;;  %v330_v6 = vld [vmem:[%s660_s2] ss:$0 sm:$0xff]  ;;  %s566_s2 = smov [#allocation8]  }
  0x31   :  { %456 = vset.pattern.permute.xlu1 %v561_v10  ;;  %457 = vset.pattern.permute.xlu0 %v562_v11  ;;  %v331_v10 = vld [vmem:[%s662_s4] ss:$0 sm:$0xff]  ;;  %s320_s11 = sshll.u32 %s566_s2, 4  ;;  %s321_s11 = int_to_ptr.vmem [resolvable:$true] %s320_s11 }
  0x32   :  { %87 = vperm.xlu1 %456, %v62_v3   ;;  %93 = vperm.xlu0 %457, %v62_v3   ;;  %s525_s4 = scalar_lea.vmem %s321_s11, 128  ;;  %p530_p2 = scmp.lt.s32.totalorder %s321_s11, %s321_s11 }
  0x33   :  { %373 = vmatpush3.msra.mxu0 %v123_v9  ;;  %406 = vmatpush3.msra.mxu1 %v218_v24  ;;  %p526_p1 = scmp.ne.s32.totalorder %s321_s11, %s525_s4  ;;  %p531_p3 = scmp.lt.s32.totalorder %s525_s4, %s525_s4 }
  0x34   :  { %374 = vmatprep.subr.mxu0 %v558_v2  ;;  %407 = vmatprep.subr.mxu1 %v558_v2 }
  0x35   :  { %375 = vmatpush3.msra.mxu0 %v122_v12  ;;  %408 = vmatpush3.msra.mxu1 %v217_v26  ;;  %p532_p4 = por %p531_p3, %p530_p2 }
  0x36   :  { %458 = vset.pattern.permute.xlu1 %v563_v14  ;;  %376 = vmatprep.subr.mxu0 %v558_v2 }
  0x37   :  { %99 = vperm.xlu1 %458, %v62_v3   ;;  %377 = vmatpush3.msra.mxu0 %v121_v13  ;;  %p533_p5 = pnand %p532_p4, %p526_p1 }
  0x38   :  { %378 = vmatprep.subr.mxu0 %v558_v2  ;;  %460 = vset.pattern.permute.xlu0 %v564_v17 }
  0x39   :  { %379 = vmatpush3.msra.mxu0 %v120_v15  ;;  %409 = vmatprep.subr.mxu1 %v558_v2 }
  0x3a   :  { %380 = vmatprep.subr.mxu0 %v558_v2  ;;  %410 = vmatpush3.msra.mxu1 %v216_v28 }
  0x3b   :  { %459 = vset.pattern.permute.xlu1 %v564_v17  ;;  %381 = vmatpush3.msra.mxu0 %v119_v16 }
  0x3c   :  { %105 = vperm.xlu1 %459, %v62_v3   ;;  %382 = vmatprep.subr.mxu0 %v558_v2  ;;  %v207_v3 = vld [vmem:[#allocation7 + $0x10] sm:$0xff] }
  0x3d   :  { %383 = vmatpush3.msra.mxu0 %v118_v18  ;;  %411 = vmatprep.subr.mxu1 %v558_v2 }
  0x3e   :  { %384 = vmatprep.subr.mxu0 %v558_v2  ;;  %412 = vmatpush3.msra.mxu1 %v215_v30 }
  0x3f   :  { %385 = vmatpush3.msra.mxu0 %v117_v19  ;;  %413 = vmatprep.subr.mxu1 %v558_v2 }
  0x40   :  { %386 = vmatprep.subr.mxu0 %v558_v2  ;;  %414 = vmatpush3.msra.mxu1 %v214_v32 }
  0x41   :  { %387 = vmatpush3.msra.mxu0 %v116_v20  ;;  %415 = vmatprep.subr.mxu1 %v558_v2 }
  0x42   :  { %388 = vmatprep.subr.mxu0 %v558_v2  ;;  %416 = vmatpush3.msra.mxu1 %v213_v33 }
  0x43   :  { %389 = vmatpush3.msra.mxu0 %v115_v23  ;;  %417 = vmatprep.subr.mxu1 %v558_v2 }
  0x44   :  { %390 = vmatprep.subr.mxu0 %v558_v2  ;;  %418 = vmatpush3.msra.mxu1 %v212_v34 }
  0x45   :  { %391 = vmatpush3.msra.mxu0 %v114_v25  ;;  %419 = vmatprep.subr.mxu1 %v558_v2 }
  0x46   :  { %392 = vmatprep.subr.mxu0 %v558_v2  ;;  %420 = vmatpush3.msra.mxu1 %v211_v35 }
  0x47   :  { %393 = vmatpush3.msra.mxu0 %v113_v27  ;;  %421 = vmatprep.subr.mxu1 %v558_v2 }
  0x48   :  { %394 = vmatprep.subr.mxu0 %v558_v2  ;;  %422 = vmatpush3.msra.mxu1 %v210_v36 }
  0x49   :  { %395 = vmatpush3.msra.mxu0 %v112_v29  ;;  %423 = vmatprep.subr.mxu1 %v558_v2 }
  0x4a   :  { %396 = vmatprep.subr.mxu0 %v558_v2  ;;  %424 = vmatpush3.msra.mxu1 %v209_v37 }
  0x4b   :  { %397 = vmatpush3.msra.mxu0 %v111_v31  ;;  %425 = vmatprep.subr.mxu1 %v558_v2 }
  0x4c   :  { %426 = vmatpush3.msra.mxu1 %v208_v38 }
  0x4d   :  { %427 = vmatprep.subr.mxu1 %v558_v2 }
  0x4e   :  { %428 = vmatpush3.msra.mxu1 %v207_v3 }
  0x4f   :  { %429 = vmatprep.subr.mxu1 %v558_v2 }
  0x50   :  { %430 = vmatpush3.msra.mxu1 %v206_v4 }
  0x51   :  { %431 = vmatprep.subr.mxu1 %v558_v2 }
  0x52   :  { %432 = vmatpush3.msra.mxu1 %v205_v5 }
  0xa3   :  { %v76_v40 = vpop.permute.xlu1 %75  ;;  %v65_v41 = vpop.permute.xlu0 %64 }
  0xa4   :  { %vm66_vm1 = vcmp.eq.s32.totalorder %v65_v41, %v61_v42  ;;  %vm77_vm2 = vcmp.eq.s32.totalorder %v76_v40, %v61_v42 }
  0xa5   :  { %v67_v45 = vsel %vm66_vm1, 1, %v557_v1  ;;  %v78_v48 = vsel %vm77_vm2, 1, %v557_v1 }
  0xa8   :  { %v82_v43 = vpop.permute.xlu1 %81  ;;  %v70_v44 = vpop.permute.xlu0 %69 }
  0xa9   :  { %vm71_vm3 = vcmp.eq.s32.totalorder %v70_v44, %v61_v42  ;;  %vm83_vm4 = vcmp.eq.s32.totalorder %v82_v43, %v61_v42 }
  0xaa   :  { %v72_v46 = vsel %vm71_vm3, 1, %v557_v1  ;;  %v84_v52 = vsel %vm83_vm4, 1, %v557_v1 }
  0xab   :  { %v73_v47 = vadd.s32 %v72_v46, %v67_v45 }
  0xad   :  { %v79_v49 = vadd.s32 %v78_v48, %v73_v47  ;;  %v88_v50 = vpop.permute.xlu1 %87  ;;  %v94_v51 = vpop.permute.xlu0 %93 }
  0xae   :  { %vm89_vm5 = vcmp.eq.s32.totalorder %v88_v50, %v61_v42  ;;  %vm95_vm6 = vcmp.eq.s32.totalorder %v94_v51, %v61_v42 }
  0xaf   :  { %v85_v53 = vadd.s32 %v84_v52, %v79_v49  ;;  %v90_v54 = vsel %vm89_vm5, 1, %v557_v1  ;;  %v96_v56 = vsel %vm95_vm6, 1, %v557_v1 }
  0xb1   :  { %v91_v55 = vadd.s32 %v90_v54, %v85_v53 }
  0xb2   :  { %v100_v57 = vpop.permute.xlu1 %99 }
  0xb3   :  { %vm101_vm7 = vcmp.eq.s32.totalorder %v100_v57, %v61_v42  ;;  %v97_v58 = vadd.s32 %v96_v56, %v91_v55 }
  0xb4   :  { %v102_v59 = vsel %vm101_vm7, 1, %v557_v1 }
  0xb5   :  { %v103_v61 = vadd.s32 %v102_v59, %v97_v58 }
  0xb7   :  { %v106_v60 = vpop.permute.xlu1 %105 }
  0xb8   :  { %vm107_vm8 = vcmp.eq.s32.totalorder %v106_v60, %v61_v42 }
  0xb9   :  { %v108_v62 = vsel %vm107_vm8, 1, %v557_v1 }
  0xba   :  { %v109_v63 = vadd.s32 %v108_v62, %v103_v61 }
  0xbc   :  { %v110_v0 = vcvt.s32.f32 %v109_v63 }
  0xbe   :  { %399 = vmatmul.mubr.f32.vlgmr.msra.gmra.mxu0 %v110_v0 }
 0x17e   :  { %v200_v7 = vpop.f32.mrf.mxu0 }
 0x17f   :  { %v201_v8 = vadd.f32 %v330_v6, %v200_v7 }
 0x180   :  { %v400_v1 = vpop.f32.mrf.mxu0 }
 0x181   :  { %v204_v9 = vmax.f32 %v201_v8, 0.0 }
 0x183   :  { %434 = vmatmul.mubr.f32.vlgmr.msra.gmra.mxu1 %v204_v9 }
 0x243   :  { %v294_v11 = vpop.f32.mrf.mxu1 }
 0x244   :  { %v295_v12 = vadd.f32 %v331_v10, %v294_v11 }
 0x245   :  { %v435_v13 = vpop.f32.mrf.mxu1 }
 0x246   :  { %v301_v2 = vsel %vm298_vm9, %v295_v12, -1e+30 }
 0x247   :  { %302 = vmax.xlane.f32.xlu0 %v301_v2 }
 0x2d0   :  { %v303_v14 = vpop.xlane.xlu0 %302 }
 0x2d1   :  { %v304_v15 = vsub.f32 %v295_v12, %v303_v14 }
 0x2d3   :  { %v305_v16 = vmul.f32 1.442695, %v304_v15 }
 0x2d5   :  { %461 = vpow2.f32 %v305_v16 }
 0x2e2   :  { %v462_v17 = vpop.eup %461 }
 0x2e3   :  { %v307_v18 = vsel %vm298_vm9, %v462_v17, 0.0 }
 0x2e4   :  { %308 = vadd.xlane.f32.xlu1 %v307_v18 }
 0x36d   :  { %v309_v19 = vpop.xlane.xlu1 %308 }
 0x36e   :  { %463 = vlog2.f32 %v309_v19 }
 0x37b   :  { %v464_v20 = vpop.eup %463 }
 0x37c   :  { %v311_v21 = vmul.f32 0.6931472, %v464_v20 }
 0x37e   :  { %v312_v22 = vsub.f32 %v304_v15, %v311_v21 }
 0x380   :  { %313 = vst [vmem:[#allocation8] sm:$0xff] %v312_v22 }
 0x381   :  { %536 = shalt.err (!%p533_p5)
}
 0x382   :  { %323 = dma.vmem_to_hbm [thread:$0]  %s321_s11, 128, %s663_s5, [#allocation4]  }
 0x383   :  { %549 = dma.done.wait [#allocation4], 128  }
 0x384   :  { %550 = vsyncadd [#allocation4], 4294967168 }
 0x385   :  { %327 = vsyncpa [#allocation3], 1 }
 0x386   :  { %328 = vsyncpa [#allocation6], 1 }
 0x387   :  { %329 = vsyncpa [#allocation4], 1 }

</bundles_post_ra>
